<compile_context>
chip_gen: v7x
topology: tpu7x:2x2x1
jax: 0.10.0
libtpu: 0.0.40
codegen_flags: <defaults>
</compile_context>

<pallas_src>
import jax
import jax.numpy as jnp
from jax import lax
from jax.experimental import pallas as pl
from jax.experimental.pallas import tpu as pltpu


_ADJ_DMA_GRANULE = 8 * 1024 * 1024   # per-buffer cap when packing graphs per step


def _round_up(x, m):
    return ((x + m - 1) // m) * m


def _cdiv(a, b):
    return -(-a // b)


def _vmem_budgets():
    """Generation-aware (vmem_limit_bytes, tile-planning budget)."""
    cap = None
    try:
        info = pltpu.get_tpu_info()
        for name in ("vmem_capacity_bytes", "vmem_size_bytes", "vmem_bytes"):
            v = getattr(info, name, None)
            if v:
                cap = int(v)
                break
    except Exception:
        cap = None
    if not cap or cap <= 0:
        cap = 64 * 1024 * 1024                      # conservative (v7x physical)
    limit = min(int(cap * 0.80), 112 * 1024 * 1024)  # scoped-VMEM request
    budget = int(limit * 0.85)                       # planning budget (headroom)
    return limit, budget


def _block_spec(shape, index_map, *, single_buffer=False):
    """BlockSpec, optionally single-buffered (resident blocks waste a 2nd buffer)."""
    if single_buffer and hasattr(pl, "Buffered"):
        try:
            return pl.BlockSpec(shape, index_map, pipeline_mode=pl.Buffered(1))
        except TypeError:          # pipeline_mode / positional Buffered unsupported
            pass
    return pl.BlockSpec(shape, index_map)


# --------------------------------------------------------------------------
# Kernels
# --------------------------------------------------------------------------
def _make_fused_kernel(n_layer, residual_mode, activate_last):
    """All GCN layers + residual + relu fused; adjacency resident in VMEM."""

    def kernel(*refs):
        idx = 0
        h_ref = refs[idx]; idx += 1
        adj_ref = refs[idx]; idx += 1
        wt_refs = refs[idx:idx + n_layer]; idx += n_layer
        b_refs = refs[idx:idx + n_layer]; idx += n_layer
        alpha_ref = None
        if residual_mode == "attention":
            alpha_ref = refs[idx]; idx += 1
        o_ref = refs[idx]

        h_ori = h_ref[...].astype(jnp.float32)
        # Upcast the (possibly bf16) adjacency once; reused by every layer.
        adjf = adj_ref[...].astype(jnp.float32)

        x = h_ori
        for li in range(n_layer):
            hw = lax.dot_general(
                x, wt_refs[li][...],
                dimension_numbers=(((2,), (0,)), ((), ())),
                preferred_element_type=jnp.float32) + b_refs[li][...]
            x = lax.dot_general(
                adjf, hw,
                dimension_numbers=(((2,), (1,)), ((0,), (0,))),
                preferred_element_type=jnp.float32)
            if li < n_layer - 1:
                x = jnp.maximum(x, 0.0)

        if residual_mode == "attention":
            alpha = alpha_ref[...].astype(jnp.float32)
            x = alpha * x + (1.0 - alpha) * h_ori
        elif residual_mode == "add":
            x = x + h_ori
        if activate_last:
            x = jnp.maximum(x, 0.0)
        o_ref[...] = x.astype(o_ref.dtype)

    return kernel


def _make_layer_kernel(residual_mode, apply_relu):
    """One GCN layer, adjacency streamed as row tiles; hw kept in VMEM scratch."""

    def kernel(*refs):
        if residual_mode == "attention":
            h_ref, adj_ref, wt_ref, b_ref, hori_ref, alpha_ref, o_ref, hw_ref = refs
        elif residual_mode == "add":
            h_ref, adj_ref, wt_ref, b_ref, hori_ref, o_ref, hw_ref = refs
            alpha_ref = None
        else:
            h_ref, adj_ref, wt_ref, b_ref, o_ref, hw_ref = refs
            hori_ref = alpha_ref = None

        # hw = h @ W^T + b : once per batch block (row tile 0), then resident.
        @pl.when(pl.program_id(1) == 0)
        def _():
            hw = lax.dot_general(
                h_ref[...], wt_ref[...],
                dimension_numbers=(((2,), (0,)), ((), ())),
                preferred_element_type=jnp.float32)
            hw_ref[...] = hw + b_ref[...]

        # out_tile = adj_tile @ hw  (adjacency upcast in-kernel; f32 accumulate).
        out = lax.dot_general(
            adj_ref[...].astype(jnp.float32), hw_ref[...],
            dimension_numbers=(((2,), (1,)), ((0,), (0,))),
            preferred_element_type=jnp.float32)

        if residual_mode == "attention":
            alpha = alpha_ref[...].astype(jnp.float32)
            out = alpha * out + (1.0 - alpha) * hori_ref[...].astype(jnp.float32)
        elif residual_mode == "add":
            out = out + hori_ref[...].astype(jnp.float32)
        if apply_relu:
            out = jnp.maximum(out, 0.0)
        o_ref[...] = out.astype(o_ref.dtype)

    return kernel


# --------------------------------------------------------------------------
# pallas_call wrappers
# --------------------------------------------------------------------------
def _fused_call(h_p, adj_p, wts, bs, alpha_p, *, residual_mode, activate_last,
                out_dtype, tb, vmem_limit_bytes, single_buffer):
    B, n_pad, f_pad = h_p.shape
    n_layer = len(wts)
    kernel = _make_fused_kernel(n_layer, residual_mode, activate_last)

    in_specs = [
        pl.BlockSpec((tb, n_pad, f_pad), lambda bi: (bi, 0, 0)),       # h / h_ori
        pl.BlockSpec((tb, n_pad, n_pad), lambda bi: (bi, 0, 0)),       # adjacency
    ]
    for _ in range(n_layer):                                           # W^T (constant)
        in_specs.append(_block_spec((f_pad, f_pad), lambda bi: (0, 0),
                                    single_buffer=single_buffer))
    for _ in range(n_layer):                                           # bias (constant)
        in_specs.append(_block_spec((1, f_pad), lambda bi: (0, 0),
                                    single_buffer=single_buffer))
    args = [h_p, adj_p, *wts, *bs]
    if residual_mode == "attention":
        in_specs.append(pl.BlockSpec((tb, 1, f_pad), lambda bi: (bi, 0, 0)))
        args.append(alpha_p)

    return pl.pallas_call(
        kernel,
        out_shape=jax.ShapeDtypeStruct((B, n_pad, f_pad), out_dtype),
        grid_spec=pltpu.PrefetchScalarGridSpec(
            num_scalar_prefetch=0,
            grid=(B // tb,),
            in_specs=in_specs,
            out_specs=pl.BlockSpec((tb, n_pad, f_pad), lambda bi: (bi, 0, 0)),
        ),
        compiler_params=pltpu.CompilerParams(
            dimension_semantics=("parallel",),
            vmem_limit_bytes=vmem_limit_bytes),
    )(*args)


def _layer_call(x, adj, w_t, bias, h_ori, alpha, *, residual_mode, apply_relu,
                out_dtype, tm, vmem_limit_bytes, single_buffer):
    B, n_pad, f_pad = x.shape
    tb = 1
    grid = (B // tb, n_pad // tm)
    kernel = _make_layer_kernel(residual_mode, apply_relu)

    in_specs = [
        _block_spec((tb, n_pad, f_pad), lambda bi, ri: (bi, 0, 0),
                    single_buffer=single_buffer),                      # h (row-invariant)
        pl.BlockSpec((tb, tm, n_pad), lambda bi, ri: (bi, ri, 0)),     # adj row tile
        _block_spec((f_pad, f_pad), lambda bi, ri: (0, 0),
                    single_buffer=single_buffer),                      # W^T
        _block_spec((1, f_pad), lambda bi, ri: (0, 0),
                    single_buffer=single_buffer),                      # bias
    ]
    args = [x, adj, w_t, bias]
    if residual_mode != "none":
        in_specs.append(pl.BlockSpec((tb, tm, f_pad), lambda bi, ri: (bi, ri, 0)))
        args.append(h_ori)
    if residual_mode == "attention":
        in_specs.append(_block_spec((tb, 1, f_pad), lambda bi, ri: (bi, 0, 0),
                                    single_buffer=single_buffer))
        args.append(alpha)

    return pl.pallas_call(
        kernel,
        out_shape=jax.ShapeDtypeStruct((B, n_pad, f_pad), out_dtype),
        grid_spec=pltpu.PrefetchScalarGridSpec(
            num_scalar_prefetch=0,
            grid=grid,
            in_specs=in_specs,
            out_specs=pl.BlockSpec((tb, tm, f_pad), lambda bi, ri: (bi, ri, 0)),
            scratch_shapes=[pltpu.VMEM((tb, n_pad, f_pad), jnp.float32)]),
        compiler_params=pltpu.CompilerParams(
            # Row-tile axis carries the pl.when(ri==0)-gated hw scratch -> arbitrary.
            dimension_semantics=("parallel", "arbitrary"),
            vmem_limit_bytes=vmem_limit_bytes),
    )(*args)


# --------------------------------------------------------------------------
# Tiling / batch-packing heuristics
# --------------------------------------------------------------------------
def _fused_batch_tile(B, n_pad, f_pad, adj_isz, n_layer, budget):
    """Largest divisor of B whose fused working set fits VMEM; None if infeasible."""
    upcast = 4 if adj_isz < 4 else 0

    def footprint(tb):
        fp = tb * n_pad * n_pad * (2 * adj_isz + upcast)   # adj (dbl-buf) + f32 copy
        fp += 2 * tb * n_pad * f_pad * 4                    # h (dbl-buf)
        fp += 2 * tb * n_pad * f_pad * 4                    # out (dbl-buf)
        fp += 3 * tb * n_pad * f_pad * 4                    # live f32 temps (x, hw)
        fp += n_layer * (f_pad * f_pad + f_pad) * 4         # weights + biases
        fp += 2 * tb * f_pad * 4                            # alpha
        return fp

    if footprint(1) > budget:
        return None
    for d in range(B, 0, -1):
        if B % d:
            continue
        if footprint(d) <= budget and (
                d == 1 or d * n_pad * n_pad * adj_isz <= _ADJ_DMA_GRANULE):
            return d
    return 1


def _tiled_row_tile(n_pad8, f_pad, adj_isz, has_residual, budget, max_tile_rows):
    """(tm, n_pad): evenly split the 8-rounded node count (no tile-multiple pad)."""
    upcast = 4 if adj_isz < 4 else 0
    fixed = (2 * n_pad8 * f_pad * 4      # h block (counted dbl-buf for safety)
             + n_pad8 * f_pad * 4        # hw scratch (f32)
             + f_pad * f_pad * 4         # W^T
             + 2 * f_pad * 4)            # bias + alpha
    per_row = (n_pad8 * (2 * adj_isz + upcast)   # adj tile (dbl-buf) + f32 copy
               + 2 * f_pad * 4                   # out tile (dbl-buf)
               + (2 * f_pad * 4 if has_residual else 0)
               + 2 * f_pad * 4)                  # compute headroom
    if fixed > budget:
        # TODO(synk): add a K-tiling grid axis over n_pad chunks of h/hw here.
        raise ValueError(
            f"graph too large for single-pass hw scratch "
            f"({fixed} B fixed footprint > {budget} B VMEM budget)")

    tm_max = 8
    for cand in (8192, 4096, 2048, 1024, 512, 256, 128, 64, 32, 16, 8):
        if fixed + cand * per_row <= budget:
            tm_max = cand
            break
    if max_tile_rows is not None:
        tm_max = min(tm_max, max(8, _round_up(int(max_tile_rows), 8)))
    tm_max = max(8, min(tm_max, n_pad8))

    num_tiles = _cdiv(n_pad8, tm_max)
    tm = _round_up(_cdiv(n_pad8, num_tiles), 8)
    return tm, tm * num_tiles


def _pad_features(h, n_pad, f_pad):
    B, N, F = h.shape
    if (N, F) == (n_pad, f_pad) and h.dtype == jnp.float32:
        return h                                    # no-op pad skipped
    out = jnp.zeros((B, n_pad, f_pad), jnp.float32)
    return out.at[:, :N, :F].set(h.astype(jnp.float32))


def _pad_adjacency(adj, n_pad, adj_dtype):
    B, N, _ = adj.shape
    if N == n_pad:                                  # no-op pad skipped
        return adj if adj.dtype == adj_dtype else adj.astype(adj_dtype)
    out = jnp.zeros((B, n_pad, n_pad), adj_dtype)
    return out.at[:, :N, :N].set(adj.astype(adj_dtype))


# --------------------------------------------------------------------------
# Public forward
# --------------------------------------------------------------------------
def _forward(h, adj, gcn_weights, gcn_biases, attn_weight, attn_bias, *,
             residual_connection, activate_last, adj_dtype, allow_fused,
             max_tile_rows, single_buffer):
    B, N, F = h.shape
    n_layer = len(gcn_weights)
    assert n_layer >= 1
    out_dtype = h.dtype

    f_pad = _round_up(F, 128)                    # lane-dense output
    n_pad8 = _round_up(max(N, 8), 8)             # sublane-aligned nodes
    adj_isz = jnp.dtype(adj_dtype).itemsize
    vmem_limit, budget = _vmem_budgets()

    # alpha = sigmoid(Linear(mean_N(h))) : tiny [B,F]@[F,1]; plain XLA,
    # pre-broadcast along the lane dim so the kernel just does an FMA.
    alpha_p = None
    if residual_connection == "attention":
        h_mean = jnp.mean(h.astype(jnp.float32), axis=1)
        a = jnp.matmul(h_mean, attn_weight.astype(jnp.float32).T,
                       precision=lax.Precision.HIGHEST) + attn_bias.astype(jnp.float32)
        alpha_p = jnp.broadcast_to(jax.nn.sigmoid(a)[:, :, None],
                                   (B, 1, f_pad)).astype(jnp.float32)

    # Padded f32 weights / biases (tiny).
    wts, bs = [], []
    for li in range(n_layer):
        wts.append(jnp.zeros((f_pad, f_pad), jnp.float32)
                   .at[:F, :F].set(gcn_weights[li].T.astype(jnp.float32)))
        bs.append(jnp.zeros((1, f_pad), jnp.float32)
                  .at[0, :F].set(gcn_biases[li].astype(jnp.float32)))

    tb_fused = (_fused_batch_tile(B, n_pad8, f_pad, adj_isz, n_layer, budget)
                if allow_fused else None)

    if tb_fused is not None:
        # Fused path: adjacency resident per batch block, read once for all layers.
        h_p = _pad_features(h, n_pad8, f_pad)
        adj_p = _pad_adjacency(adj, n_pad8, adj_dtype)
        out = _fused_call(h_p, adj_p, wts, bs, alpha_p,
                          residual_mode=residual_connection,
                          activate_last=activate_last, out_dtype=out_dtype,
                          tb=tb_fused, vmem_limit_bytes=vmem_limit,
                          single_buffer=single_buffer)
        return out[:, :N, :F].astype(out_dtype)

    # Per-layer path: adjacency streamed as row tiles, hw resident in scratch.
    tm, n_pad = _tiled_row_tile(n_pad8, f_pad, adj_isz,
                                residual_connection != "none", budget,
                                max_tile_rows)
    h_p = _pad_features(h, n_pad, f_pad)
    adj_p = _pad_adjacency(adj, n_pad, adj_dtype)

    x = h_p
    for li in range(n_layer):
        is_last = li == n_layer - 1
        mode = residual_connection if is_last else "none"
        relu = activate_last if is_last else True
        x = _layer_call(
            x, adj_p, wts[li], bs[li],
            h_p if mode != "none" else None,
            alpha_p if mode == "attention" else None,
            residual_mode=mode, apply_relu=relu,
            out_dtype=out_dtype if is_last else jnp.float32,
            tm=tm, vmem_limit_bytes=vmem_limit, single_buffer=single_buffer)
    return x[:, :N, :F].astype(out_dtype)


def graph_convolution_block(h, adj, gcn_weights, gcn_biases,
                            attn_weight=None, attn_bias=None, *,
                            residual_connection="attention",
                            activate_last=True,
                            adj_dtype=jnp.bfloat16,
                            allow_fused=True,
                            max_tile_rows=None):
    """Pallas TPU forward of GraphConvolutionBlock.

    h: [B, N, F], adj: [B, N, N].
    gcn_weights[i]: [F, F] (PyTorch [out, in]); gcn_biases[i]: [F].
    attn_weight: [1, F], attn_bias: [1] (residual_connection='attention').
    adj_dtype=bfloat16 halves the dominant N^2 adjacency DMA and is exact for
    0/1 adjacencies (use jnp.float32 for weighted/normalized graphs); features,
    hw and accumulation always stay float32.
    """
    assert residual_connection in ("none", "add", "attention")
    B, N, F = h.shape
    assert adj.shape == (B, N, N)
    kwargs = dict(residual_connection=residual_connection,
                  activate_last=activate_last, adj_dtype=adj_dtype,
                  allow_fused=allow_fused, max_tile_rows=max_tile_rows)
    try:
        return _forward(h, adj, list(gcn_weights), list(gcn_biases),
                        attn_weight, attn_bias, single_buffer=True, **kwargs)
    except Exception:
        # Retry without the single-buffer (pl.Buffered(1)) pipeline hint.
        return _forward(h, adj, list(gcn_weights), list(gcn_biases),
                        attn_weight, attn_bias, single_buffer=False, **kwargs)


# --------------------------------------------------------------------------
# Pure-JAX reference + self-test
# --------------------------------------------------------------------------
def _block_reference(h, adj, gcn_weights, gcn_biases, attn_weight, attn_bias,
                     residual_connection="attention", activate_last=True):
    hp = lax.Precision.HIGHEST
    h_ori = h
    x = h
    for i in range(len(gcn_weights)):
        x = jnp.einsum("bnf,gf->bng", x, gcn_weights[i], precision=hp) + gcn_biases[i]
        x = jnp.einsum("bij,bjf->bif", adj, x, precision=hp)
        if i < len(gcn_weights) - 1:
            x = jnp.maximum(x, 0.0)
    if residual_connection == "add":
        x = x + h_ori
    elif residual_connection == "attention":
        h_mean = jnp.mean(h_ori, axis=1)
        alpha = jax.nn.sigmoid(
            jnp.matmul(h_mean, attn_weight.T, precision=hp) + attn_bias)
        x = alpha[:, :, None] * x + (1.0 - alpha[:, :, None]) * h_ori
    if activate_last:
        x = jnp.maximum(x, 0.0)
    return x


if __name__ == "__main__":
    key = jax.random.PRNGKey(0)
    ks = jax.random.split(key, 9)

    # --- Case 1: module's example shapes: adj = eye(5) x3, h_dim = 7 (fused path) ---
    B, N, F = 3, 5, 7
    h = jax.random.normal(ks[0], (B, N, F), jnp.float32)
    adj = jnp.tile(jnp.eye(N, dtype=jnp.float32)[None, :, :], (B, 1, 1))

    bound = 1.0 / float(F) ** 0.5
    W0 = jax.random.uniform(ks[1], (F, F), jnp.float32, -bound, bound)
    b0 = jax.random.uniform(ks[2], (F,), jnp.float32, -bound, bound)
    W1 = jax.random.uniform(ks[3], (F, F), jnp.float32, -bound, bound)
    b1 = jax.random.uniform(ks[4], (F,), jnp.float32, -bound, bound)
    Wa = jax.random.uniform(ks[5], (1, F), jnp.float32, -bound, bound)
    ba = jax.random.uniform(ks[6], (1,), jnp.float32, -bound, bound)

    ref = _block_reference(h, adj, [W0, W1], [b0, b1], Wa, ba,
                           residual_connection="attention", activate_last=True)
    out = graph_convolution_block(h, adj, [W0, W1], [b0, b1], Wa, ba,
                                  residual_connection="attention",
                                  activate_last=True)
    out = jax.block_until_ready(out)
    assert out.shape == (B, N, F)
    assert jnp.allclose(out, ref, atol=1e-4, rtol=1e-4), "mismatch (small, fused)"

    # --- Case 2: larger binary graph: fused path and forced row-tiled path ---
    B2, N2 = 2, 300
    h2 = jax.random.normal(ks[7], (B2, N2, F), jnp.float32)
    adj2 = (jax.random.uniform(ks[8], (B2, N2, N2)) < 0.05).astype(jnp.float32)
    adj2 = adj2 + jnp.tile(jnp.eye(N2, dtype=jnp.float32)[None, :, :], (B2, 1, 1))

    ref2 = _block_reference(h2, adj2, [W0, W1], [b0, b1], Wa, ba,
                            residual_connection="attention", activate_last=True)

    out2 = graph_convolution_block(h2, adj2, [W0, W1], [b0, b1], Wa, ba,
                                   residual_connection="attention",
                                   activate_last=True)
    out2 = jax.block_until_ready(out2)
    assert out2.shape == (B2, N2, F)
    assert jnp.allclose(out2, ref2, atol=1e-3, rtol=1e-3), "mismatch (fused, N=300)"

    out2t = graph_convolution_block(h2, adj2, [W0, W1], [b0, b1], Wa, ba,
                                    residual_connection="attention",
                                    activate_last=True,
                                    allow_fused=False, max_tile_rows=128)
    out2t = jax.block_until_ready(out2t)
    assert out2t.shape == (B2, N2, F)
    assert jnp.allclose(out2t, ref2, atol=1e-3, rtol=1e-3), "mismatch (tiled, N=300)"

    print("KERNEL_OK")
</pallas_src>

<mosaic_0001>
module attributes {stable_mosaic.version = 11 : i64} {
  func.func @kernel(%arg0: i32, %arg1: memref<3x8x128xf32, #tpu.memory_space<vmem>>, %arg2: memref<3x8x8xbf16, #tpu.memory_space<vmem>>, %arg3: memref<128x128xf32, #tpu.memory_space<vmem>>, %arg4: memref<128x128xf32, #tpu.memory_space<vmem>>, %arg5: memref<1x128xf32, #tpu.memory_space<vmem>>, %arg6: memref<1x128xf32, #tpu.memory_space<vmem>>, %arg7: memref<3x1x128xf32, #tpu.memory_space<vmem>>, %arg8: memref<3x8x128xf32, #tpu.memory_space<vmem>>) attributes {dimension_semantics = [#tpu.dimension_semantics<parallel>], iteration_bounds = array<i64: 1>, scalar_prefetch = 0 : i64, scratch_operands = 0 : i64, tpu.core_type = #tpu.core_type<tc>, window_params = [{transform_indices = @transform_0, window_bounds = array<i64: 3, 8, 128>}, {transform_indices = @transform_1, window_bounds = array<i64: 3, 8, 8>}, {pipeline_mode = #tpu.pipeline_mode<synchronous>, transform_indices = @transform_2, window_bounds = array<i64: 128, 128>}, {pipeline_mode = #tpu.pipeline_mode<synchronous>, transform_indices = @transform_3, window_bounds = array<i64: 128, 128>}, {pipeline_mode = #tpu.pipeline_mode<synchronous>, transform_indices = @transform_4, window_bounds = array<i64: 1, 128>}, {pipeline_mode = #tpu.pipeline_mode<synchronous>, transform_indices = @transform_5, window_bounds = array<i64: 1, 128>}, {transform_indices = @transform_6, window_bounds = array<i64: 3, 1, 128>}, {transform_indices = @transform_7, window_bounds = array<i64: 3, 8, 128>}]} {
    %c0 = arith.constant 0 : index
    %c0_0 = arith.constant 0 : index
    %c0_1 = arith.constant 0 : index
    %0 = vector.load %arg1[%c0, %c0_0, %c0_1] : memref<3x8x128xf32, #tpu.memory_space<vmem>>, vector<3x8x128xf32>
    %c0_2 = arith.constant 0 : index
    %c0_3 = arith.constant 0 : index
    %c0_4 = arith.constant 0 : index
    %1 = vector.load %arg2[%c0_2, %c0_3, %c0_4] : memref<3x8x8xbf16, #tpu.memory_space<vmem>>, vector<3x8x8xbf16>
    %2 = arith.extf %1 : vector<3x8x8xbf16> to vector<3x8x8xf32>
    %c0_5 = arith.constant 0 : index
    %c0_6 = arith.constant 0 : index
    %3 = vector.load %arg3[%c0_5, %c0_6] : memref<128x128xf32, #tpu.memory_space<vmem>>, vector<128x128xf32>
    %cst = arith.constant dense<0.000000e+00> : vector<3x8x128xf32>
    %4 = tpu.matmul %0, %3, %cst {dimension_numbers = #tpu.dot_dimension_numbers<[2], [0], [0, 1], [1], [0, 0, 0, 1, 1, 1], [], []>} : vector<3x8x128xf32>, vector<128x128xf32>, vector<3x8x128xf32> -> vector<3x8x128xf32>
    %c0_7 = arith.constant 0 : index
    %c0_8 = arith.constant 0 : index
    %5 = vector.load %arg5[%c0_7, %c0_8] : memref<1x128xf32, #tpu.memory_space<vmem>>, vector<1x128xf32>
    %6 = vector.shape_cast %5 : vector<1x128xf32> to vector<1x1x128xf32>
    %7 = vector.broadcast %6 : vector<1x1x128xf32> to vector<3x8x128xf32>
    %8 = arith.addf %4, %7 : vector<3x8x128xf32>
    %cst_9 = arith.constant dense<0.000000e+00> : vector<3x8x128xf32>
    %9 = tpu.matmul %2, %8, %cst_9 {dimension_numbers = #tpu.dot_dimension_numbers<[2], [1], [1], [2], [0, 0, 0, 1, 1, 2], [0], [0]>} : vector<3x8x8xf32>, vector<3x8x128xf32>, vector<3x8x128xf32> -> vector<3x8x128xf32>
    %cst_10 = arith.constant 0.000000e+00 : f32
    %10 = vector.broadcast %cst_10 : f32 to vector<3x8x128xf32>
    %11 = arith.maximumf %9, %10 : vector<3x8x128xf32>
    %c0_11 = arith.constant 0 : index
    %c0_12 = arith.constant 0 : index
    %12 = vector.load %arg4[%c0_11, %c0_12] : memref<128x128xf32, #tpu.memory_space<vmem>>, vector<128x128xf32>
    %cst_13 = arith.constant dense<0.000000e+00> : vector<3x8x128xf32>
    %13 = tpu.matmul %11, %12, %cst_13 {dimension_numbers = #tpu.dot_dimension_numbers<[2], [0], [0, 1], [1], [0, 0, 0, 1, 1, 1], [], []>} : vector<3x8x128xf32>, vector<128x128xf32>, vector<3x8x128xf32> -> vector<3x8x128xf32>
    %c0_14 = arith.constant 0 : index
    %c0_15 = arith.constant 0 : index
    %14 = vector.load %arg6[%c0_14, %c0_15] : memref<1x128xf32, #tpu.memory_space<vmem>>, vector<1x128xf32>
    %15 = vector.shape_cast %14 : vector<1x128xf32> to vector<1x1x128xf32>
    %16 = vector.broadcast %15 : vector<1x1x128xf32> to vector<3x8x128xf32>
    %17 = arith.addf %13, %16 : vector<3x8x128xf32>
    %cst_16 = arith.constant dense<0.000000e+00> : vector<3x8x128xf32>
    %18 = tpu.matmul %2, %17, %cst_16 {dimension_numbers = #tpu.dot_dimension_numbers<[2], [1], [1], [2], [0, 0, 0, 1, 1, 2], [0], [0]>} : vector<3x8x8xf32>, vector<3x8x128xf32>, vector<3x8x128xf32> -> vector<3x8x128xf32>
    %c0_17 = arith.constant 0 : index
    %c0_18 = arith.constant 0 : index
    %c0_19 = arith.constant 0 : index
    %19 = vector.load %arg7[%c0_17, %c0_18, %c0_19] : memref<3x1x128xf32, #tpu.memory_space<vmem>>, vector<3x1x128xf32>
    %20 = vector.broadcast %19 : vector<3x1x128xf32> to vector<3x8x128xf32>
    %21 = arith.mulf %20, %18 : vector<3x8x128xf32>
    %cst_20 = arith.constant 1.000000e+00 : f32
    %22 = vector.broadcast %cst_20 : f32 to vector<3x1x128xf32>
    %23 = arith.subf %22, %19 : vector<3x1x128xf32>
    %24 = vector.broadcast %23 : vector<3x1x128xf32> to vector<3x8x128xf32>
    %25 = arith.mulf %24, %0 : vector<3x8x128xf32>
    %26 = arith.addf %21, %25 : vector<3x8x128xf32>
    %cst_21 = arith.constant 0.000000e+00 : f32
    %27 = vector.broadcast %cst_21 : f32 to vector<3x8x128xf32>
    %28 = arith.maximumf %26, %27 : vector<3x8x128xf32>
    %c0_22 = arith.constant 0 : index
    %c0_23 = arith.constant 0 : index
    %c0_24 = arith.constant 0 : index
    %29 = vector.load %arg8[%c0_22, %c0_23, %c0_24] : memref<3x8x128xf32, #tpu.memory_space<vmem>>, vector<3x8x128xf32>
    tpu.vector_store %arg8[%c0_22, %c0_23, %c0_24], %28 {strides = array<i32>} : memref<3x8x128xf32, #tpu.memory_space<vmem>>, vector<3x8x128xf32>,
    return
  }
  func.func @transform_0(%arg0: i32) -> (i32, i32, i32) {
    %c0_i32 = arith.constant 0 : i32
    %c0_i32_0 = arith.constant 0 : i32
    %c0_i32_1 = arith.constant 0 : i32
    return %arg0, %c0_i32, %c0_i32_0 : i32, i32, i32
  }
  func.func @transform_1(%arg0: i32) -> (i32, i32, i32) {
    %c0_i32 = arith.constant 0 : i32
    %c0_i32_0 = arith.constant 0 : i32
    %c0_i32_1 = arith.constant 0 : i32
    return %arg0, %c0_i32, %c0_i32_0 : i32, i32, i32
  }
  func.func @transform_2(%arg0: i32) -> (i32, i32) {
    %c0_i32 = arith.constant 0 : i32
    %c0_i32_0 = arith.constant 0 : i32
    %c0_i32_1 = arith.constant 0 : i32
    return %c0_i32, %c0_i32_0 : i32, i32
  }
  func.func @transform_3(%arg0: i32) -> (i32, i32) {
    %c0_i32 = arith.constant 0 : i32
    %c0_i32_0 = arith.constant 0 : i32
    %c0_i32_1 = arith.constant 0 : i32
    return %c0_i32, %c0_i32_0 : i32, i32
  }
  func.func @transform_4(%arg0: i32) -> (i32, i32) {
    %c0_i32 = arith.constant 0 : i32
    %c0_i32_0 = arith.constant 0 : i32
    %c0_i32_1 = arith.constant 0 : i32
    return %c0_i32, %c0_i32_0 : i32, i32
  }
  func.func @transform_5(%arg0: i32) -> (i32, i32) {
    %c0_i32 = arith.constant 0 : i32
    %c0_i32_0 = arith.constant 0 : i32
    %c0_i32_1 = arith.constant 0 : i32
    return %c0_i32, %c0_i32_0 : i32, i32
  }
  func.func @transform_6(%arg0: i32) -> (i32, i32, i32) {
    %c0_i32 = arith.constant 0 : i32
    %c0_i32_0 = arith.constant 0 : i32
    %c0_i32_1 = arith.constant 0 : i32
    return %arg0, %c0_i32, %c0_i32_0 : i32, i32, i32
  }
  func.func @transform_7(%arg0: i32) -> (i32, i32, i32) {
    %c0_i32 = arith.constant 0 : i32
    %c0_i32_0 = arith.constant 0 : i32
    %c0_i32_1 = arith.constant 0 : i32
    return %arg0, %c0_i32, %c0_i32_0 : i32, i32, i32
  }
}

module attributes {stable_mosaic.version = 11 : i64} {
  func.func @kernel(%arg0: i32, %arg1: memref<3x8x128xf32, #tpu.memory_space<vmem>>, %arg2: memref<3x8x8xbf16, #tpu.memory_space<vmem>>, %arg3: memref<128x128xf32, #tpu.memory_space<vmem>>, %arg4: memref<128x128xf32, #tpu.memory_space<vmem>>, %arg5: memref<1x128xf32, #tpu.memory_space<vmem>>, %arg6: memref<1x128xf32, #tpu.memory_space<vmem>>, %arg7: memref<3x1x128xf32, #tpu.memory_space<vmem>>, %arg8: memref<3x8x128xf32, #tpu.memory_space<vmem>>) attributes {dimension_semantics = [#tpu.dimension_semantics<parallel>], iteration_bounds = array<i64: 1>, scalar_prefetch = 0 : i64, scratch_operands = 0 : i64, tpu.core_type = #tpu.core_type<tc>, window_params = [{transform_indices = @transform_0, window_bounds = array<i64: 3, 8, 128>}, {transform_indices = @transform_1, window_bounds = array<i64: 3, 8, 8>}, {pipeline_mode = #tpu.pipeline_mode<synchronous>, transform_indices = @transform_2, window_bounds = array<i64: 128, 128>}, {pipeline_mode = #tpu.pipeline_mode<synchronous>, transform_indices = @transform_3, window_bounds = array<i64: 128, 128>}, {pipeline_mode = #tpu.pipeline_mode<synchronous>, transform_indices = @transform_4, window_bounds = array<i64: 1, 128>}, {pipeline_mode = #tpu.pipeline_mode<synchronous>, transform_indices = @transform_5, window_bounds = array<i64: 1, 128>}, {transform_indices = @transform_6, window_bounds = array<i64: 3, 1, 128>}, {transform_indices = @transform_7, window_bounds = array<i64: 3, 8, 128>}]} {
    %c0 = arith.constant 0 : index
    %c0_0 = arith.constant 0 : index
    %c0_1 = arith.constant 0 : index
    %0 = vector.load %arg1[%c0, %c0_0, %c0_1] : memref<3x8x128xf32, #tpu.memory_space<vmem>>, vector<3x8x128xf32>
    %c0_2 = arith.constant 0 : index
    %c0_3 = arith.constant 0 : index
    %c0_4 = arith.constant 0 : index
    %1 = vector.load %arg2[%c0_2, %c0_3, %c0_4] : memref<3x8x8xbf16, #tpu.memory_space<vmem>>, vector<3x8x8xbf16>
    %2 = arith.extf %1 : vector<3x8x8xbf16> to vector<3x8x8xf32>
    %c0_5 = arith.constant 0 : index
    %c0_6 = arith.constant 0 : index
    %3 = vector.load %arg3[%c0_5, %c0_6] : memref<128x128xf32, #tpu.memory_space<vmem>>, vector<128x128xf32>
    %cst = arith.constant dense<0.000000e+00> : vector<3x8x128xf32>
    %4 = tpu.matmul %0, %3, %cst {dimension_numbers = #tpu.dot_dimension_numbers<[2], [0], [0, 1], [1], [0, 0, 0, 1, 1, 1], [], []>} : vector<3x8x128xf32>, vector<128x128xf32>, vector<3x8x128xf32> -> vector<3x8x128xf32>
    %c0_7 = arith.constant 0 : index
    %c0_8 = arith.constant 0 : index
    %5 = vector.load %arg5[%c0_7, %c0_8] : memref<1x128xf32, #tpu.memory_space<vmem>>, vector<1x128xf32>
    %6 = vector.shape_cast %5 : vector<1x128xf32> to vector<1x1x128xf32>
    %7 = vector.broadcast %6 : vector<1x1x128xf32> to vector<3x8x128xf32>
    %8 = arith.addf %4, %7 : vector<3x8x128xf32>
    %cst_9 = arith.constant dense<0.000000e+00> : vector<3x8x128xf32>
    %9 = tpu.matmul %2, %8, %cst_9 {dimension_numbers = #tpu.dot_dimension_numbers<[2], [1], [1], [2], [0, 0, 0, 1, 1, 2], [0], [0]>} : vector<3x8x8xf32>, vector<3x8x128xf32>, vector<3x8x128xf32> -> vector<3x8x128xf32>
    %cst_10 = arith.constant 0.000000e+00 : f32
    %10 = vector.broadcast %cst_10 : f32 to vector<3x8x128xf32>
    %11 = arith.maximumf %9, %10 : vector<3x8x128xf32>
    %c0_11 = arith.constant 0 : index
    %c0_12 = arith.constant 0 : index
    %12 = vector.load %arg4[%c0_11, %c0_12] : memref<128x128xf32, #tpu.memory_space<vmem>>, vector<128x128xf32>
    %cst_13 = arith.constant dense<0.000000e+00> : vector<3x8x128xf32>
    %13 = tpu.matmul %11, %12, %cst_13 {dimension_numbers = #tpu.dot_dimension_numbers<[2], [0], [0, 1], [1], [0, 0, 0, 1, 1, 1], [], []>} : vector<3x8x128xf32>, vector<128x128xf32>, vector<3x8x128xf32> -> vector<3x8x128xf32>
    %c0_14 = arith.constant 0 : index
    %c0_15 = arith.constant 0 : index
    %14 = vector.load %arg6[%c0_14, %c0_15] : memref<1x128xf32, #tpu.memory_space<vmem>>, vector<1x128xf32>
    %15 = vector.shape_cast %14 : vector<1x128xf32> to vector<1x1x128xf32>
    %16 = vector.broadcast %15 : vector<1x1x128xf32> to vector<3x8x128xf32>
    %17 = arith.addf %13, %16 : vector<3x8x128xf32>
    %cst_16 = arith.constant dense<0.000000e+00> : vector<3x8x128xf32>
    %18 = tpu.matmul %2, %17, %cst_16 {dimension_numbers = #tpu.dot_dimension_numbers<[2], [1], [1], [2], [0, 0, 0, 1, 1, 2], [0], [0]>} : vector<3x8x8xf32>, vector<3x8x128xf32>, vector<3x8x128xf32> -> vector<3x8x128xf32>
    %c0_17 = arith.constant 0 : index
    %c0_18 = arith.constant 0 : index
    %c0_19 = arith.constant 0 : index
    %19 = vector.load %arg7[%c0_17, %c0_18, %c0_19] : memref<3x1x128xf32, #tpu.memory_space<vmem>>, vector<3x1x128xf32>
    %20 = vector.broadcast %19 : vector<3x1x128xf32> to vector<3x8x128xf32>
    %21 = arith.mulf %20, %18 : vector<3x8x128xf32>
    %cst_20 = arith.constant 1.000000e+00 : f32
    %22 = vector.broadcast %cst_20 : f32 to vector<3x1x128xf32>
    %23 = arith.subf %22, %19 : vector<3x1x128xf32>
    %24 = vector.broadcast %23 : vector<3x1x128xf32> to vector<3x8x128xf32>
    %25 = arith.mulf %24, %0 : vector<3x8x128xf32>
    %26 = arith.addf %21, %25 : vector<3x8x128xf32>
    %cst_21 = arith.constant 0.000000e+00 : f32
    %27 = vector.broadcast %cst_21 : f32 to vector<3x8x128xf32>
    %28 = arith.maximumf %26, %27 : vector<3x8x128xf32>
    %c0_22 = arith.constant 0 : index
    %c0_23 = arith.constant 0 : index
    %c0_24 = arith.constant 0 : index
    %29 = vector.load %arg8[%c0_22, %c0_23, %c0_24] : memref<3x8x128xf32, #tpu.memory_space<vmem>>, vector<3x8x128xf32>
    tpu.vector_store %arg8[%c0_22, %c0_23, %c0_24], %28 {strides = array<i32>} : memref<3x8x128xf32, #tpu.memory_space<vmem>>, vector<3x8x128xf32>,
    return
  }
  func.func @transform_0(%arg0: i32) -> (i32, i32, i32) {
    %c0_i32 = arith.constant 0 : i32
    %c0_i32_0 = arith.constant 0 : i32
    %c0_i32_1 = arith.constant 0 : i32
    return %arg0, %c0_i32, %c0_i32_0 : i32, i32, i32
  }
  func.func @transform_1(%arg0: i32) -> (i32, i32, i32) {
    %c0_i32 = arith.constant 0 : i32
    %c0_i32_0 = arith.constant 0 : i32
    %c0_i32_1 = arith.constant 0 : i32
    return %arg0, %c0_i32, %c0_i32_0 : i32, i32, i32
  }
  func.func @transform_2(%arg0: i32) -> (i32, i32) {
    %c0_i32 = arith.constant 0 : i32
    %c0_i32_0 = arith.constant 0 : i32
    %c0_i32_1 = arith.constant 0 : i32
    return %c0_i32, %c0_i32_0 : i32, i32
  }
  func.func @transform_3(%arg0: i32) -> (i32, i32) {
    %c0_i32 = arith.constant 0 : i32
    %c0_i32_0 = arith.constant 0 : i32
    %c0_i32_1 = arith.constant 0 : i32
    return %c0_i32, %c0_i32_0 : i32, i32
  }
  func.func @transform_4(%arg0: i32) -> (i32, i32) {
    %c0_i32 = arith.constant 0 : i32
    %c0_i32_0 = arith.constant 0 : i32
    %c0_i32_1 = arith.constant 0 : i32
    return %c0_i32, %c0_i32_0 : i32, i32
  }
  func.func @transform_5(%arg0: i32) -> (i32, i32) {
    %c0_i32 = arith.constant 0 : i32
    %c0_i32_0 = arith.constant 0 : i32
    %c0_i32_1 = arith.constant 0 : i32
    return %c0_i32, %c0_i32_0 : i32, i32
  }
  func.func @transform_6(%arg0: i32) -> (i32, i32, i32) {
    %c0_i32 = arith.constant 0 : i32
    %c0_i32_0 = arith.constant 0 : i32
    %c0_i32_1 = arith.constant 0 : i32
    return %arg0, %c0_i32, %c0_i32_0 : i32, i32, i32
  }
  func.func @transform_7(%arg0: i32) -> (i32, i32, i32) {
    %c0_i32 = arith.constant 0 : i32
    %c0_i32_0 = arith.constant 0 : i32
    %c0_i32_1 = arith.constant 0 : i32
    return %arg0, %c0_i32, %c0_i32_0 : i32, i32, i32
  }
}

</mosaic_0001>

<bundles_post_ra>
// kernel: tpu_custom_call.1
= control target key start
LH: loop header
LB: loop body
LE: loop exit
PB: predicated region body
PF: predicated region fallthrough
CT: control target
= control target key end

     0   :  { %12 = vsyncpa [#allocation3], 0  ;;  %s1387_s0 = inlined_call_operand.hbm [shape: f32[3,8,128], index: 0, kind: input, shape index: {}]   ;;  %s1388_s1 = inlined_call_operand.hbm [shape: bf16[3,8,8], index: 1, kind: input, shape index: {}]   ;;  %s1389_s2 = inlined_call_operand.hbm [shape: f32[128,128], index: 2, kind: input, shape index: {}]   ;;  %s1390_s3 = inlined_call_operand.hbm [shape: f32[128,128], index: 3, kind: input, shape index: {}]   ;;  %s1391_s4 = inlined_call_operand.vmem [shape: f32[1,128], index: 4, kind: input, shape index: {}]   ;;  %s1392_s5 = inlined_call_operand.vmem [shape: f32[1,128], index: 5, kind: input, shape index: {}]   ;;  %s1393_s6 = inlined_call_operand.vmem [shape: f32[3,1,128], index: 6, kind: input, shape index: {}]   ;;  %s1394_s7 = inlined_call_operand.hbm [shape: f32[3,8,128], index: 7, kind: output, shape index: {}]  }
   0x1   :  { %13 = vsyncpa [#allocation6], 0 }
   0x2   :  { %14 = vsyncpa [#allocation9], 0 }
   0x3   :  { %15 = vsyncpa [#allocation4], 0  ;;  %s1158_s24 = smov [#allocation5]   ;;  %s1040_s28 = scalar_lea.hbm %s1388_s1, 192 }
   0x4   :  { %s33_s25 = sshll.u32 %s1158_s24, 4  ;;  %p1041_p0 = scmp.ne.s32.totalorder %s1388_s1, %s1040_s28  ;;  %s34_s25 = int_to_ptr.vmem [resolvable:$true] %s33_s25 }
   0x5   :  { %p1044_p1 = scmp.lt.u32.totalorder %s1040_s28, %s1388_s1 }
   0x7   :  { %p1046_p2 = pnand %p1044_p1, %p1041_p0 }
   0x9   :  { %1049 = shalt.err (!%p1046_p2)
}
   0xa   :  { %s1050_s10 = scalar_lea.vmem %s34_s25, 192  ;;  %p1055_p4 = scmp.lt.s32.totalorder %s34_s25, %s34_s25 }
   0xb   :  { %p1051_p3 = scmp.ne.s32.totalorder %s34_s25, %s1050_s10  ;;  %p1056_p5 = scmp.lt.s32.totalorder %s1050_s10, %s1050_s10 }
   0xd   :  { %p1057_p6 = por %p1056_p5, %p1055_p4 }
   0xf   :  { %p1058_p7 = pnand %p1057_p6, %p1051_p3 }
  0x11   :  { %1061 = shalt.err (!%p1058_p7)
}
  0x12   :  { %s1159_s11 = smov 64   ;;  %s1160_s12 = smov 4  }
  0x13   :  { %39 = dma.hbm_to_vmem [thread:$0]  %s1388_s1, 192, %s34_s25, [#allocation6], %s1159_s11, %s1159_s11, %s1160_s12  }
  0x14   :  { %s1161_s15 = smov [#allocation2]   ;;  %s1062_s19 = scalar_lea.hbm %s1387_s0, 384 }
  0x15   :  { %s21_s16 = sshll.u32 %s1161_s15, 4  ;;  %p1063_p8 = scmp.ne.s32.totalorder %s1387_s0, %s1062_s19  ;;  %s22_s16 = int_to_ptr.vmem [resolvable:$true] %s21_s16 }
  0x16   :  { %p1066_p9 = scmp.lt.u32.totalorder %s1062_s19, %s1387_s0 }
  0x18   :  { %p1068_p10 = pnand %p1066_p9, %p1063_p8 }
  0x1a   :  { %1071 = shalt.err (!%p1068_p10)
}
  0x1b   :  { %s1072_s24 = scalar_lea.vmem %s22_s16, 384  ;;  %p1077_p12 = scmp.lt.s32.totalorder %s22_s16, %s22_s16 }
  0x1c   :  { %p1073_p11 = scmp.ne.s32.totalorder %s22_s16, %s1072_s24  ;;  %p1078_p13 = scmp.lt.s32.totalorder %s1072_s24, %s1072_s24 }
  0x1e   :  { %p1079_p0 = por %p1078_p13, %p1077_p12 }
  0x20   :  { %p1080_p1 = pnand %p1079_p0, %p1073_p11 }
  0x22   :  { %1083 = shalt.err (!%p1080_p1)
}
  0x23   :  { %s1162_s1 = smov 128   ;;  %s1163_s25 = smov 8  }
  0x24   :  { %27 = dma.hbm_to_vmem [thread:$0]  %s1387_s0, 384, %s22_s16, [#allocation3], %s1162_s1, %s1162_s1, %s1163_s25  }
  0x25   :  { %s1164_s28 = smov [#allocation7]   ;;  %s1165_s30 = smov [#allocation8]  }
  0x26   :  { %s45_s29 = sshll.u32 %s1164_s28, 4  ;;  %s57_s8 = sshll.u32 %s1165_s30, 4  ;;  %s46_s29 = int_to_ptr.vmem [resolvable:$true] %s45_s29  ;;  %s1237_s8 = int_to_ptr.vmem [resolvable:$true] %s57_s8 }
  0x27   :  { %s1084_s11 = scalar_lea.hbm %s1389_s2, 2048 }
  0x28   :  { %p1085_p2 = scmp.ne.s32.totalorder %s1389_s2, %s1084_s11  ;;  %p1088_p3 = scmp.lt.u32.totalorder %s1084_s11, %s1389_s2 }
  0x2a   :  { %p1090_p4 = pnand %p1088_p3, %p1085_p2 }
  0x2c   :  { %1093 = shalt.err (!%p1090_p4)
}
  0x2d   :  { %s1094_s0 = scalar_lea.vmem %s46_s29, 2048  ;;  %p1099_p6 = scmp.lt.s32.totalorder %s46_s29, %s46_s29 }
  0x2e   :  { %p1095_p5 = scmp.ne.s32.totalorder %s46_s29, %s1094_s0  ;;  %p1100_p7 = scmp.lt.s32.totalorder %s1094_s0, %s1094_s0 }
  0x30   :  { %p1101_p8 = por %p1100_p7, %p1099_p6 }
  0x32   :  { %p1102_p9 = pnand %p1101_p8, %p1095_p5 }
  0x34   :  { %1105 = shalt.err (!%p1102_p9)
}
  0x35   :  { %51 = dma.hbm_to_vmem [thread:$0]  %s1389_s2, 2048, %s46_s29, [#allocation6], %s1162_s1, %s1162_s1, %s1163_s25  }
  0x36   :  { %s1106_s20 = scalar_lea.hbm %s1390_s3, 2048 }
  0x37   :  { %p1107_p10 = scmp.ne.s32.totalorder %s1390_s3, %s1106_s20  ;;  %p1110_p11 = scmp.lt.u32.totalorder %s1106_s20, %s1390_s3 }
  0x39   :  { %p1112_p12 = pnand %p1110_p11, %p1107_p10 }
  0x3b   :  { %1115 = shalt.err (!%p1112_p12)
}
  0x3c   :  { %s1116_s26 = scalar_lea.vmem %s1237_s8, 2048  ;;  %p1121_p0 = scmp.lt.s32.totalorder %s1237_s8, %s1237_s8 }
  0x3d   :  { %p1117_p13 = scmp.ne.s32.totalorder %s1237_s8, %s1116_s26  ;;  %p1122_p1 = scmp.lt.s32.totalorder %s1116_s26, %s1116_s26 }
  0x3f   :  { %p1123_p2 = por %p1122_p1, %p1121_p0 }
  0x41   :  { %p1124_p3 = pnand %p1123_p2, %p1117_p13 }
  0x43   :  { %1127 = shalt.err (!%p1124_p3)
}
  0x44   :  { %63 = dma.hbm_to_vmem [thread:$0]  %s1390_s3, 2048, %s1237_s8, [#allocation9], %s1162_s1, %s1162_s1, %s1163_s25  }
  0x45   :  { %1150 = dma.done.wait [#allocation3], 384  }
  0x46   :  { %1151 = vsyncadd [#allocation3], 4294966912 }
  0x47   :  { %1152 = dma.done.wait [#allocation6], 2240  }
  0x48   :  { %1153 = vsyncadd [#allocation6], 4294965056 }
  0x49   :  { %1154 = dma.done.wait [#allocation9], 2048  }
  0x4a   :  { %1155 = vsyncadd [#allocation9], 4294965248  ;;  %v1166_v0 = vmov 0.0|0.0   ;;  %vm1167_vm0 = vmmov 0   ;;  %v1168_v1 = vmov 0.0   ;;  %v91_v2 = vld [vmem:[#allocation7] sm:$0xff] }
  0x4b   :  { %980 = vmatprep.subr.bf16.mxu0 %v1166_v0  ;;  %900 = vmatprep.mubr.msk.f32.mxu0 %vm1167_vm0, %v1168_v1  ;;  %v92_v3 = vld [vmem:[#allocation7 + $0x8] sm:$0xff]  ;;  %v93_v4 = vld [vmem:[#allocation7 + $0x10] sm:$0xff]  ;;  %v94_v6 = vld [vmem:[#allocation7 + $0x18] sm:$0xff]  ;;  %vm194_vm1 = vcmask 64512  }
  0x4c   :  { %909 = vmatprep.subr.mxu1 %v1168_v1  ;;  %911 = vmatprep.mubr.msk.f32.mxu1 %vm1167_vm0, %v1168_v1  ;;  %v981_v5 = vpack.c.bf16 %v92_v3, %v91_v2  ;;  %v984_v7 = vpack.c.bf16 %v94_v6, %v93_v4  ;;  %v95_v8 = vld [vmem:[#allocation7 + $0x20] sm:$0xff]  ;;  %v96_v9 = vld [vmem:[#allocation7 + $0x28] sm:$0xff]  ;;  %v97_v11 = vld [vmem:[#allocation7 + $0x30] sm:$0xff] }
  0x4d   :  { %v987_v10 = vpack.c.bf16 %v96_v9, %v95_v8  ;;  %v98_v12 = vld [vmem:[#allocation7 + $0x38] sm:$0xff]  ;;  %v99_v14 = vld [vmem:[#allocation7 + $0x40] sm:$0xff]  ;;  %v100_v15 = vld [vmem:[#allocation7 + $0x48] sm:$0xff] }
  0x4e   :  { %982 = vmatpush3.bf16.msra.mxu0 %v981_v5  ;;  %v990_v13 = vpack.c.bf16 %v98_v12, %v97_v11  ;;  %v993_v16 = vpack.c.bf16 %v100_v15, %v99_v14  ;;  %v101_v17 = vld [vmem:[#allocation7 + $0x50] sm:$0xff]  ;;  %v102_v18 = vld [vmem:[#allocation7 + $0x58] sm:$0xff]  ;;  %v103_v20 = vld [vmem:[#allocation7 + $0x60] sm:$0xff] }
  0x4f   :  { %983 = vmatprep.subr.bf16.mxu0 %v1166_v0  ;;  %v996_v19 = vpack.c.bf16 %v102_v18, %v101_v17  ;;  %v104_v21 = vld [vmem:[#allocation7 + $0x68] sm:$0xff]  ;;  %v105_v23 = vld [vmem:[#allocation7 + $0x70] sm:$0xff]  ;;  %v106_v24 = vld [vmem:[#allocation7 + $0x78] sm:$0xff] }
  0x50   :  { %v999_v22 = vpack.c.bf16 %v104_v21, %v103_v20  ;;  %v1002_v25 = vpack.c.bf16 %v106_v24, %v105_v23  ;;  %v1287_v26 = vld [vmem:[#allocation2] sm:$0xff]  ;;  %v1293_v27 = vld [vmem:[#allocation2 + $0x8] sm:$0xff]  ;;  %v1298_v28 = vld [vmem:[#allocation2 + $0x10] sm:$0xff]  ;;  %v736_v24 = vlaneseq }
  0x51   :  { %v1303_v29 = vld [vmem:[#allocation5] sm:$0xff]   ;;  %v806_v30 = vld [vmem:[%s1391_s4] ss:$0 sm:$0xff]  ;;  %v417_v40 = vld [vmem:[#allocation8] sm:$0xff] }
  0x52   :  { %985 = vmatpush3.bf16.msra.mxu0 %v984_v7  ;;  %v816_v32 = vunpack.c.l.bf16 %v1303_v29  ;;  %v817_v35 = vunpack.c.h.bf16 %v1303_v29  ;;  %v1316_v39 = vld [vmem:[#allocation5 + $0x8] sm:$0xf]  ;;  %v418_v41 = vld [vmem:[#allocation8 + $0x8] sm:$0xff]  ;;  %v419_v47 = vld [vmem:[#allocation8 + $0x10] sm:$0xff] }
  0x53   :  { %986 = vmatprep.subr.bf16.mxu0 %v1166_v0  ;;  %v90_v43 = vunpack.c.l.bf16 %v1316_v39  ;;  %v1005_v46 = vpack.c.bf16 %v418_v41, %v417_v40  ;;  %v420_v48 = vld [vmem:[#allocation8 + $0x18] sm:$0xff]  ;;  %v421_v50 = vld [vmem:[#allocation8 + $0x20] sm:$0xff]  ;;  %v422_v51 = vld [vmem:[#allocation8 + $0x28] sm:$0xff] }
  0x54   :  { %v1008_v49 = vpack.c.bf16 %v420_v48, %v419_v47  ;;  %v1011_v52 = vpack.c.bf16 %v422_v51, %v421_v50  ;;  %v423_v53 = vld [vmem:[#allocation8 + $0x30] sm:$0xff]  ;;  %v424_v54 = vld [vmem:[#allocation8 + $0x38] sm:$0xff]  ;;  %v425_v56 = vld [vmem:[#allocation8 + $0x40] sm:$0xff] }
  0x55   :  { %v1014_v55 = vpack.c.bf16 %v424_v54, %v423_v53  ;;  %v426_v57 = vld [vmem:[#allocation8 + $0x48] sm:$0xff]  ;;  %v427_v59 = vld [vmem:[#allocation8 + $0x50] sm:$0xff]  ;;  %v428_v60 = vld [vmem:[#allocation8 + $0x58] sm:$0xff] }
  0x56   :  { %988 = vmatpush3.bf16.msra.mxu0 %v987_v10  ;;  %v1017_v58 = vpack.c.bf16 %v426_v57, %v425_v56  ;;  %v1020_v61 = vpack.c.bf16 %v428_v60, %v427_v59  ;;  %v429_v62 = vld [vmem:[#allocation8 + $0x60] sm:$0xff]  ;;  %v430_v63 = vld [vmem:[#allocation8 + $0x68] sm:$0xff]  ;;  %v431_v3 = vld [vmem:[#allocation8 + $0x70] sm:$0xff] }
  0x57   :  { %989 = vmatprep.subr.bf16.mxu0 %v1166_v0  ;;  %v1023_v2 = vpack.c.bf16 %v430_v63, %v429_v62  ;;  %v432_v4 = vld [vmem:[#allocation8 + $0x78] sm:$0xff] }
  0x58   :  { %v1026_v5 = vpack.c.bf16 %v432_v4, %v431_v3  ;;  %v810_v14 = vld [vmem:[%s1392_s5] ss:$0 sm:$0xff] }
  0x59   :  { %v730_v29 = vld [vmem:[%s1393_s6] sm:$0x1] }
  0x5a   :  { %991 = vmatpush3.bf16.msra.mxu0 %v990_v13 }
  0x5b   :  { %992 = vmatprep.subr.bf16.mxu0 %v1166_v0 }
  0x5e   :  { %994 = vmatpush3.bf16.msra.mxu0 %v993_v16 }
  0x5f   :  { %995 = vmatprep.subr.bf16.mxu0 %v1166_v0 }
  0x62   :  { %997 = vmatpush3.bf16.msra.mxu0 %v996_v19 }
  0x63   :  { %998 = vmatprep.subr.bf16.mxu0 %v1166_v0 }
  0x66   :  { %1000 = vmatpush3.bf16.msra.mxu0 %v999_v22 }
  0x67   :  { %1001 = vmatprep.subr.bf16.mxu0 %v1166_v0 }
  0x6a   :  { %1003 = vmatpush3.bf16.msra.mxu0 %v1002_v25  ;;  %v737_v25 = vshrl.u32 %v736_v24, 7 }
  0x6b   :  { %965 = vmatprep.subr.mxu0 %v1168_v1 }
  0x6d   :  { %901 = vmatmul.mubr.f32.vlgmr.msra.gmra.mrb[0].mxu0 %v1287_v26 }
  0x6e   :  { %903 = vmatprep.mubr.msk.f32.mxu0 %vm1167_vm0, %v1168_v1 }
  0x71   :  { %904 = vmatmul.mubr.f32.gmra.mrb[2].mxu0 %v1293_v27 }
  0x72   :  { %906 = vmatprep.mubr.msk.f32.mxu0 %vm1167_vm0, %v1168_v1 }
  0x75   :  { %907 = vmatmul.mubr.f32.gmra.mrb[4].mxu0 %v1298_v28 }
  0x76   :  { %967 = vmatprep.mubr.msk.f32.mxu0 %vm1167_vm0, %v1168_v1 }
 0x140   :  { %v180_v31 = vpop.f32.mrb[0].mxu0 }
 0x141   :  { %v181_v33 = vadd.f32 %v806_v30, %v180_v31  ;;  %v902_v34 = vpop.f32.mrb[1].mxu0  ;;  %v754_v31 = vsub.f32 1.0, %v730_v29 }
 0x143   :  { %910 = vmatpush3.msra.mxu1 %v181_v33 }
 0x144   :  { %912 = vmatmul.mubr.msk.f32.vlgmr.msra.gmra.mrb[0].mxu1 %vm194_vm1, %v816_v32  ;;  %v185_v36 = vpop.f32.mrb[2].mxu0  ;;  %914 = vmatprep.subr.mxu1 %v1168_v1 }
 0x145   :  { %v186_v37 = vadd.f32 %v806_v30, %v185_v36  ;;  %v905_v38 = vpop.f32.mrb[3].mxu0  ;;  %916 = vmatprep.mubr.msk.f32.mxu1 %vm1167_vm0, %v1168_v1 }
 0x147   :  { %915 = vmatpush3.msra.mxu1 %v186_v37 }
 0x148   :  { %v190_v42 = vpop.f32.mrb[4].mxu0  ;;  %917 = vmatmul.mubr.msk.f32.vlgmr.msra.gmra.mrb[2].mxu1 %vm194_vm1, %v817_v35  ;;  %919 = vmatprep.subr.mxu1 %v1168_v1 }
 0x149   :  { %v191_v44 = vadd.f32 %v806_v30, %v190_v42  ;;  %v908_v45 = vpop.f32.mrb[5].mxu0  ;;  %921 = vmatprep.mubr.msk.f32.mxu1 %vm1167_vm0, %v1168_v1  ;;  %v738_v30 = vsub.s32 0, %v737_v25 }
 0x14b   :  { %920 = vmatpush3.msra.mxu1 %v191_v44  ;;  %v763_v33 = vrot.slane %v754_v31, %v738_v30 }
 0x14c   :  { %922 = vmatmul.mubr.msk.f32.vlgmr.msra.gmra.mrb[4].mxu1 %vm194_vm1, %v90_v43  ;;  %1004 = vmatprep.subr.bf16.mxu1 %v1166_v0 }
 0x14d   :  { %1006 = vmatpush3.bf16.msra.mxu1 %v1005_v46  ;;  %956 = vmatprep.mubr.msk.f32.mxu1 %vm1167_vm0, %v1168_v1  ;;  %v775_v36 = vmul.f32 %v763_v33, %v1287_v26 }
 0x14e   :  { %1007 = vmatprep.subr.bf16.mxu1 %v1166_v0 }
 0x151   :  { %1009 = vmatpush3.bf16.msra.mxu1 %v1008_v49 }
 0x152   :  { %1010 = vmatprep.subr.bf16.mxu1 %v1166_v0 }
 0x155   :  { %1012 = vmatpush3.bf16.msra.mxu1 %v1011_v52 }
 0x156   :  { %1013 = vmatprep.subr.bf16.mxu1 %v1166_v0 }
 0x159   :  { %1015 = vmatpush3.bf16.msra.mxu1 %v1014_v55 }
 0x15a   :  { %1016 = vmatprep.subr.bf16.mxu1 %v1166_v0 }
 0x15d   :  { %1018 = vmatpush3.bf16.msra.mxu1 %v1017_v58 }
 0x15e   :  { %1019 = vmatprep.subr.bf16.mxu1 %v1166_v0 }
 0x161   :  { %1021 = vmatpush3.bf16.msra.mxu1 %v1020_v61 }
 0x162   :  { %1022 = vmatprep.subr.bf16.mxu1 %v1166_v0 }
 0x165   :  { %1024 = vmatpush3.bf16.msra.mxu1 %v1023_v2 }
 0x166   :  { %1025 = vmatprep.subr.bf16.mxu1 %v1166_v0 }
 0x169   :  { %1027 = vmatpush3.bf16.msra.mxu1 %v1026_v5 }
 0x217   :  { %v264_v6 = vpop.f32.mrb[0].mxu1 }
 0x218   :  { %v414_v7 = vmax.f32 %v264_v6, 0.0  ;;  %v913_v8 = vpop.f32.mrb[1].mxu1 }
 0x21a   :  { %957 = vmatmul.mubr.f32.vlgmr.msra.gmra.mrb[6].mxu1 %v414_v7 }
 0x21b   :  { %v337_v9 = vpop.f32.mrb[2].mxu1  ;;  %959 = vmatprep.mubr.msk.f32.mxu1 %vm1167_vm0, %v1168_v1 }
 0x21c   :  { %v415_v10 = vmax.f32 %v337_v9, 0.0  ;;  %v918_v11 = vpop.f32.mrb[3].mxu1 }
 0x21e   :  { %960 = vmatmul.mubr.f32.gmra.mrb[8].mxu1 %v415_v10 }
 0x21f   :  { %v410_v12 = vpop.f32.mrb[4].mxu1  ;;  %962 = vmatprep.mubr.msk.f32.mxu1 %vm1167_vm0, %v1168_v1 }
 0x220   :  { %v416_v0 = vmax.f32 %v410_v12, 0.0  ;;  %v923_v13 = vpop.f32.mrb[5].mxu1 }
 0x222   :  { %963 = vmatmul.mubr.f32.gmra.mrb[10].mxu1 %v416_v0 }
 0x2ed   :  { %v506_v15 = vpop.f32.mrb[6].mxu1 }
 0x2ee   :  { %v507_v16 = vadd.f32 %v810_v14, %v506_v15  ;;  %v958_v17 = vpop.f32.mrb[7].mxu1 }
 0x2f0   :  { %966 = vmatpush3.msra.mxu0 %v507_v16 }
 0x2f1   :  { %v511_v18 = vpop.f32.mrb[8].mxu1  ;;  %968 = vmatmul.mubr.msk.f32.vlgmr.msra.gmra.mrb[6].mxu0 %vm194_vm1, %v816_v32  ;;  %970 = vmatprep.subr.mxu0 %v1168_v1  ;;  %v731_v32 = vld [vmem:[%s1393_s6 + $0x1] sm:$0x1] }
 0x2f2   :  { %v512_v19 = vadd.f32 %v810_v14, %v511_v18  ;;  %v961_v20 = vpop.f32.mrb[9].mxu1  ;;  %972 = vmatprep.mubr.msk.f32.mxu0 %vm1167_vm0, %v1168_v1  ;;  %v755_v34 = vsub.f32 1.0, %v731_v32  ;;  %v743_v42 = vrot.slane %v731_v32, %v738_v30 }
 0x2f4   :  { %971 = vmatpush3.msra.mxu0 %v512_v19  ;;  %v767_v37 = vrot.slane %v755_v34, %v738_v30 }
 0x2f5   :  { %v516_v21 = vpop.f32.mrb[10].mxu1  ;;  %973 = vmatmul.mubr.msk.f32.vlgmr.msra.gmra.mrb[8].mxu0 %vm194_vm1, %v817_v35  ;;  %975 = vmatprep.subr.mxu0 %v1168_v1  ;;  %v739_v35 = vrot.slane %v730_v29, %v738_v30 }
 0x2f6   :  { %v517_v22 = vadd.f32 %v810_v14, %v516_v21  ;;  %v964_v23 = vpop.f32.mrb[11].mxu1  ;;  %977 = vmatprep.mubr.msk.f32.mxu0 %vm1167_vm0, %v1168_v1  ;;  %v732_v1 = vld [vmem:[%s1393_s6 + $0x2] sm:$0x1]  ;;  %s1169_s6 = smov [#allocation10]  }
 0x2f7   :  { %v756_v38 = vsub.f32 1.0, %v732_v1  ;;  %v747_v50 = vrot.slane %v732_v1, %v738_v30  ;;  %s792_s12 = sshll.u32 %s1169_s6, 4  ;;  %s793_s12 = int_to_ptr.vmem [resolvable:$true] %s792_s12 }
 0x2f8   :  { %976 = vmatpush3.msra.mxu0 %v517_v22  ;;  %s1128_s13 = scalar_lea.vmem %s793_s12, 384  ;;  %p1133_p5 = scmp.lt.s32.totalorder %s793_s12, %s793_s12 }
 0x2f9   :  { %978 = vmatmul.mubr.msk.f32.vlgmr.msra.gmra.mrb[10].mxu0 %vm194_vm1, %v90_v43  ;;  %v776_v43 = vmul.f32 %v767_v37, %v1293_v27  ;;  %v771_v44 = vrot.slane %v756_v38, %v738_v30  ;;  %p1129_p4 = scmp.ne.s32.totalorder %s793_s12, %s1128_s13  ;;  %p1134_p6 = scmp.lt.s32.totalorder %s1128_s13, %s1128_s13 }
 0x2fb   :  { %v777_v51 = vmul.f32 %v771_v44, %v1298_v28  ;;  %p1135_p7 = por %p1134_p6, %p1133_p5 }
 0x2fd   :  { %p1136_p8 = pnand %p1135_p7, %p1129_p4 }
 0x3c4   :  { %v586_v39 = vpop.f32.mrb[6].mxu0 }
 0x3c5   :  { %v751_v40 = vmul.f32 %v739_v35, %v586_v39  ;;  %v969_v41 = vpop.f32.mrb[7].mxu0 }
 0x3c7   :  { %v778_v45 = vadd.f32 %v775_v36, %v751_v40 }
 0x3c8   :  { %v656_v46 = vpop.f32.mrb[8].mxu0 }
 0x3c9   :  { %v781_v47 = vmax.f32 %v778_v45, 0.0  ;;  %v752_v48 = vmul.f32 %v743_v42, %v656_v46  ;;  %v974_v49 = vpop.f32.mrb[9].mxu0 }
 0x3cb   :  { %784 = vst [vmem:[#allocation10] sm:$0xff] %v781_v47  ;;  %v779_v52 = vadd.f32 %v776_v43, %v752_v48 }
 0x3cc   :  { %v726_v26 = vpop.f32.mrb[10].mxu0 }
 0x3cd   :  { %v782_v53 = vmax.f32 %v779_v52, 0.0  ;;  %v753_v54 = vmul.f32 %v747_v50, %v726_v26  ;;  %v979_v55 = vpop.f32.mrb[11].mxu0 }
 0x3cf   :  { %785 = vst [vmem:[#allocation10 + $0x8] sm:$0xff] %v782_v53  ;;  %v780_v56 = vadd.f32 %v777_v51, %v753_v54 }
 0x3d1   :  { %v783_v27 = vmax.f32 %v780_v56, 0.0 }
 0x3d3   :  { %786 = vst [vmem:[#allocation10 + $0x10] sm:$0xff] %v783_v27 }
 0x3d4   :  { %1139 = shalt.err (!%p1136_p8)
}
 0x3d5   :  { %s1140_s0 = scalar_lea.hbm %s1394_s7, 384 }
 0x3d6   :  { %p1141_p9 = scmp.ne.s32.totalorder %s1394_s7, %s1140_s0  ;;  %p1144_p10 = scmp.lt.u32.totalorder %s1140_s0, %s1394_s7 }
 0x3d8   :  { %p1146_p11 = pnand %p1144_p10, %p1141_p9 }
 0x3da   :  { %1149 = shalt.err (!%p1146_p11)
}
 0x3db   :  { %798 = dma.vmem_to_hbm [thread:$0]  %s793_s12, 384, %s1394_s7, [#allocation4], %s1162_s1, %s1162_s1, %s1163_s25  }
 0x3dc   :  { %1156 = dma.done.wait [#allocation4], 384  }
 0x3dd   :  { %1157 = vsyncadd [#allocation4], 4294966912 }
 0x3de   :  { %802 = vsyncpa [#allocation3], 1 }
 0x3df   :  { %803 = vsyncpa [#allocation6], 1 }
 0x3e0   :  { %804 = vsyncpa [#allocation9], 1 }
 0x3e1   :  { %805 = vsyncpa [#allocation4], 1 }

// kernel: tpu_custom_call.1
= control target key start
LH: loop header
LB: loop body
LE: loop exit
PB: predicated region body
PF: predicated region fallthrough
CT: control target
= control target key end

     0   :  { %12 = vsyncpa [#allocation3], 0  ;;  %s1387_s0 = inlined_call_operand.hbm [shape: f32[3,8,128], index: 0, kind: input, shape index: {}]   ;;  %s1388_s1 = inlined_call_operand.hbm [shape: bf16[3,8,8], index: 1, kind: input, shape index: {}]   ;;  %s1389_s2 = inlined_call_operand.hbm [shape: f32[128,128], index: 2, kind: input, shape index: {}]   ;;  %s1390_s3 = inlined_call_operand.hbm [shape: f32[128,128], index: 3, kind: input, shape index: {}]   ;;  %s1391_s4 = inlined_call_operand.vmem [shape: f32[1,128], index: 4, kind: input, shape index: {}]   ;;  %s1392_s5 = inlined_call_operand.vmem [shape: f32[1,128], index: 5, kind: input, shape index: {}]   ;;  %s1393_s6 = inlined_call_operand.vmem [shape: f32[3,1,128], index: 6, kind: input, shape index: {}]   ;;  %s1394_s7 = inlined_call_operand.hbm [shape: f32[3,8,128], index: 7, kind: output, shape index: {}]  }
   0x1   :  { %13 = vsyncpa [#allocation6], 0 }
   0x2   :  { %14 = vsyncpa [#allocation9], 0 }
   0x3   :  { %15 = vsyncpa [#allocation4], 0  ;;  %s1158_s24 = smov [#allocation5]   ;;  %s1040_s28 = scalar_lea.hbm %s1388_s1, 192 }
   0x4   :  { %s33_s25 = sshll.u32 %s1158_s24, 4  ;;  %p1041_p0 = scmp.ne.s32.totalorder %s1388_s1, %s1040_s28  ;;  %s34_s25 = int_to_ptr.vmem [resolvable:$true] %s33_s25 }
   0x5   :  { %p1044_p1 = scmp.lt.u32.totalorder %s1040_s28, %s1388_s1 }
   0x7   :  { %p1046_p2 = pnand %p1044_p1, %p1041_p0 }
   0x9   :  { %1049 = shalt.err (!%p1046_p2)
}
   0xa   :  { %s1050_s10 = scalar_lea.vmem %s34_s25, 192  ;;  %p1055_p4 = scmp.lt.s32.totalorder %s34_s25, %s34_s25 }
   0xb   :  { %p1051_p3 = scmp.ne.s32.totalorder %s34_s25, %s1050_s10  ;;  %p1056_p5 = scmp.lt.s32.totalorder %s1050_s10, %s1050_s10 }
   0xd   :  { %p1057_p6 = por %p1056_p5, %p1055_p4 }
   0xf   :  { %p1058_p7 = pnand %p1057_p6, %p1051_p3 }
  0x11   :  { %1061 = shalt.err (!%p1058_p7)
}
  0x12   :  { %s1159_s11 = smov 64   ;;  %s1160_s12 = smov 4  }
  0x13   :  { %39 = dma.hbm_to_vmem [thread:$0]  %s1388_s1, 192, %s34_s25, [#allocation6], %s1159_s11, %s1159_s11, %s1160_s12  }
  0x14   :  { %s1161_s15 = smov [#allocation2]   ;;  %s1062_s19 = scalar_lea.hbm %s1387_s0, 384 }
  0x15   :  { %s21_s16 = sshll.u32 %s1161_s15, 4  ;;  %p1063_p8 = scmp.ne.s32.totalorder %s1387_s0, %s1062_s19  ;;  %s22_s16 = int_to_ptr.vmem [resolvable:$true] %s21_s16 }
  0x16   :  { %p1066_p9 = scmp.lt.u32.totalorder %s1062_s19, %s1387_s0 }
  0x18   :  { %p1068_p10 = pnand %p1066_p9, %p1063_p8 }
  0x1a   :  { %1071 = shalt.err (!%p1068_p10)
}
  0x1b   :  { %s1072_s24 = scalar_lea.vmem %s22_s16, 384  ;;  %p1077_p12 = scmp.lt.s32.totalorder %s22_s16, %s22_s16 }
  0x1c   :  { %p1073_p11 = scmp.ne.s32.totalorder %s22_s16, %s1072_s24  ;;  %p1078_p13 = scmp.lt.s32.totalorder %s1072_s24, %s1072_s24 }
  0x1e   :  { %p1079_p0 = por %p1078_p13, %p1077_p12 }
  0x20   :  { %p1080_p1 = pnand %p1079_p0, %p1073_p11 }
  0x22   :  { %1083 = shalt.err (!%p1080_p1)
}
  0x23   :  { %s1162_s1 = smov 128   ;;  %s1163_s25 = smov 8  }
  0x24   :  { %27 = dma.hbm_to_vmem [thread:$0]  %s1387_s0, 384, %s22_s16, [#allocation3], %s1162_s1, %s1162_s1, %s1163_s25  }
  0x25   :  { %s1164_s28 = smov [#allocation7]   ;;  %s1165_s30 = smov [#allocation8]  }
  0x26   :  { %s45_s29 = sshll.u32 %s1164_s28, 4  ;;  %s57_s8 = sshll.u32 %s1165_s30, 4  ;;  %s46_s29 = int_to_ptr.vmem [resolvable:$true] %s45_s29  ;;  %s1237_s8 = int_to_ptr.vmem [resolvable:$true] %s57_s8 }
  0x27   :  { %s1084_s11 = scalar_lea.hbm %s1389_s2, 2048 }
  0x28   :  { %p1085_p2 = scmp.ne.s32.totalorder %s1389_s2, %s1084_s11  ;;  %p1088_p3 = scmp.lt.u32.totalorder %s1084_s11, %s1389_s2 }
  0x2a   :  { %p1090_p4 = pnand %p1088_p3, %p1085_p2 }
  0x2c   :  { %1093 = shalt.err (!%p1090_p4)
}
  0x2d   :  { %s1094_s0 = scalar_lea.vmem %s46_s29, 2048  ;;  %p1099_p6 = scmp.lt.s32.totalorder %s46_s29, %s46_s29 }
  0x2e   :  { %p1095_p5 = scmp.ne.s32.totalorder %s46_s29, %s1094_s0  ;;  %p1100_p7 = scmp.lt.s32.totalorder %s1094_s0, %s1094_s0 }
  0x30   :  { %p1101_p8 = por %p1100_p7, %p1099_p6 }
  0x32   :  { %p1102_p9 = pnand %p1101_p8, %p1095_p5 }
  0x34   :  { %1105 = shalt.err (!%p1102_p9)
}
  0x35   :  { %51 = dma.hbm_to_vmem [thread:$0]  %s1389_s2, 2048, %s46_s29, [#allocation6], %s1162_s1, %s1162_s1, %s1163_s25  }
  0x36   :  { %s1106_s20 = scalar_lea.hbm %s1390_s3, 2048 }
  0x37   :  { %p1107_p10 = scmp.ne.s32.totalorder %s1390_s3, %s1106_s20  ;;  %p1110_p11 = scmp.lt.u32.totalorder %s1106_s20, %s1390_s3 }
  0x39   :  { %p1112_p12 = pnand %p1110_p11, %p1107_p10 }
  0x3b   :  { %1115 = shalt.err (!%p1112_p12)
}
  0x3c   :  { %s1116_s26 = scalar_lea.vmem %s1237_s8, 2048  ;;  %p1121_p0 = scmp.lt.s32.totalorder %s1237_s8, %s1237_s8 }
  0x3d   :  { %p1117_p13 = scmp.ne.s32.totalorder %s1237_s8, %s1116_s26  ;;  %p1122_p1 = scmp.lt.s32.totalorder %s1116_s26, %s1116_s26 }
  0x3f   :  { %p1123_p2 = por %p1122_p1, %p1121_p0 }
  0x41   :  { %p1124_p3 = pnand %p1123_p2, %p1117_p13 }
  0x43   :  { %1127 = shalt.err (!%p1124_p3)
}
  0x44   :  { %63 = dma.hbm_to_vmem [thread:$0]  %s1390_s3, 2048, %s1237_s8, [#allocation9], %s1162_s1, %s1162_s1, %s1163_s25  }
  0x45   :  { %1150 = dma.done.wait [#allocation3], 384  }
  0x46   :  { %1151 = vsyncadd [#allocation3], 4294966912 }
  0x47   :  { %1152 = dma.done.wait [#allocation6], 2240  }
  0x48   :  { %1153 = vsyncadd [#allocation6], 4294965056 }
  0x49   :  { %1154 = dma.done.wait [#allocation9], 2048  }
  0x4a   :  { %1155 = vsyncadd [#allocation9], 4294965248  ;;  %v1166_v0 = vmov 0.0|0.0   ;;  %vm1167_vm0 = vmmov 0   ;;  %v1168_v1 = vmov 0.0   ;;  %v91_v2 = vld [vmem:[#allocation7] sm:$0xff] }
  0x4b   :  { %980 = vmatprep.subr.bf16.mxu0 %v1166_v0  ;;  %900 = vmatprep.mubr.msk.f32.mxu0 %vm1167_vm0, %v1168_v1  ;;  %v92_v3 = vld [vmem:[#allocation7 + $0x8] sm:$0xff]  ;;  %v93_v4 = vld [vmem:[#allocation7 + $0x10] sm:$0xff]  ;;  %v94_v6 = vld [vmem:[#allocation7 + $0x18] sm:$0xff]  ;;  %vm194_vm1 = vcmask 64512  }
  0x4c   :  { %909 = vmatprep.subr.mxu1 %v1168_v1  ;;  %911 = vmatprep.mubr.msk.f32.mxu1 %vm1167_vm0, %v1168_v1  ;;  %v981_v5 = vpack.c.bf16 %v92_v3, %v91_v2  ;;  %v984_v7 = vpack.c.bf16 %v94_v6, %v93_v4  ;;  %v95_v8 = vld [vmem:[#allocation7 + $0x20] sm:$0xff]  ;;  %v96_v9 = vld [vmem:[#allocation7 + $0x28] sm:$0xff]  ;;  %v97_v11 = vld [vmem:[#allocation7 + $0x30] sm:$0xff] }
  0x4d   :  { %v987_v10 = vpack.c.bf16 %v96_v9, %v95_v8  ;;  %v98_v12 = vld [vmem:[#allocation7 + $0x38] sm:$0xff]  ;;  %v99_v14 = vld [vmem:[#allocation7 + $0x40] sm:$0xff]  ;;  %v100_v15 = vld [vmem:[#allocation7 + $0x48] sm:$0xff] }
  0x4e   :  { %982 = vmatpush3.bf16.msra.mxu0 %v981_v5  ;;  %v990_v13 = vpack.c.bf16 %v98_v12, %v97_v11  ;;  %v993_v16 = vpack.c.bf16 %v100_v15, %v99_v14  ;;  %v101_v17 = vld [vmem:[#allocation7 + $0x50] sm:$0xff]  ;;  %v102_v18 = vld [vmem:[#allocation7 + $0x58] sm:$0xff]  ;;  %v103_v20 = vld [vmem:[#allocation7 + $0x60] sm:$0xff] }
  0x4f   :  { %983 = vmatprep.subr.bf16.mxu0 %v1166_v0  ;;  %v996_v19 = vpack.c.bf16 %v102_v18, %v101_v17  ;;  %v104_v21 = vld [vmem:[#allocation7 + $0x68] sm:$0xff]  ;;  %v105_v23 = vld [vmem:[#allocation7 + $0x70] sm:$0xff]  ;;  %v106_v24 = vld [vmem:[#allocation7 + $0x78] sm:$0xff] }
  0x50   :  { %v999_v22 = vpack.c.bf16 %v104_v21, %v103_v20  ;;  %v1002_v25 = vpack.c.bf16 %v106_v24, %v105_v23  ;;  %v1287_v26 = vld [vmem:[#allocation2] sm:$0xff]  ;;  %v1293_v27 = vld [vmem:[#allocation2 + $0x8] sm:$0xff]  ;;  %v1298_v28 = vld [vmem:[#allocation2 + $0x10] sm:$0xff]  ;;  %v736_v24 = vlaneseq }
  0x51   :  { %v1303_v29 = vld [vmem:[#allocation5] sm:$0xff]   ;;  %v806_v30 = vld [vmem:[%s1391_s4] ss:$0 sm:$0xff]  ;;  %v417_v40 = vld [vmem:[#allocation8] sm:$0xff] }
  0x52   :  { %985 = vmatpush3.bf16.msra.mxu0 %v984_v7  ;;  %v816_v32 = vunpack.c.l.bf16 %v1303_v29  ;;  %v817_v35 = vunpack.c.h.bf16 %v1303_v29  ;;  %v1316_v39 = vld [vmem:[#allocation5 + $0x8] sm:$0xf]  ;;  %v418_v41 = vld [vmem:[#allocation8 + $0x8] sm:$0xff]  ;;  %v419_v47 = vld [vmem:[#allocation8 + $0x10] sm:$0xff] }
  0x53   :  { %986 = vmatprep.subr.bf16.mxu0 %v1166_v0  ;;  %v90_v43 = vunpack.c.l.bf16 %v1316_v39  ;;  %v1005_v46 = vpack.c.bf16 %v418_v41, %v417_v40  ;;  %v420_v48 = vld [vmem:[#allocation8 + $0x18] sm:$0xff]  ;;  %v421_v50 = vld [vmem:[#allocation8 + $0x20] sm:$0xff]  ;;  %v422_v51 = vld [vmem:[#allocation8 + $0x28] sm:$0xff] }
  0x54   :  { %v1008_v49 = vpack.c.bf16 %v420_v48, %v419_v47  ;;  %v1011_v52 = vpack.c.bf16 %v422_v51, %v421_v50  ;;  %v423_v53 = vld [vmem:[#allocation8 + $0x30] sm:$0xff]  ;;  %v424_v54 = vld [vmem:[#allocation8 + $0x38] sm:$0xff]  ;;  %v425_v56 = vld [vmem:[#allocation8 + $0x40] sm:$0xff] }
  0x55   :  { %v1014_v55 = vpack.c.bf16 %v424_v54, %v423_v53  ;;  %v426_v57 = vld [vmem:[#allocation8 + $0x48] sm:$0xff]  ;;  %v427_v59 = vld [vmem:[#allocation8 + $0x50] sm:$0xff]  ;;  %v428_v60 = vld [vmem:[#allocation8 + $0x58] sm:$0xff] }
  0x56   :  { %988 = vmatpush3.bf16.msra.mxu0 %v987_v10  ;;  %v1017_v58 = vpack.c.bf16 %v426_v57, %v425_v56  ;;  %v1020_v61 = vpack.c.bf16 %v428_v60, %v427_v59  ;;  %v429_v62 = vld [vmem:[#allocation8 + $0x60] sm:$0xff]  ;;  %v430_v63 = vld [vmem:[#allocation8 + $0x68] sm:$0xff]  ;;  %v431_v3 = vld [vmem:[#allocation8 + $0x70] sm:$0xff] }
  0x57   :  { %989 = vmatprep.subr.bf16.mxu0 %v1166_v0  ;;  %v1023_v2 = vpack.c.bf16 %v430_v63, %v429_v62  ;;  %v432_v4 = vld [vmem:[#allocation8 + $0x78] sm:$0xff] }
  0x58   :  { %v1026_v5 = vpack.c.bf16 %v432_v4, %v431_v3  ;;  %v810_v14 = vld [vmem:[%s1392_s5] ss:$0 sm:$0xff] }
  0x59   :  { %v730_v29 = vld [vmem:[%s1393_s6] sm:$0x1] }
  0x5a   :  { %991 = vmatpush3.bf16.msra.mxu0 %v990_v13 }
  0x5b   :  { %992 = vmatprep.subr.bf16.mxu0 %v1166_v0 }
  0x5e   :  { %994 = vmatpush3.bf16.msra.mxu0 %v993_v16 }
  0x5f   :  { %995 = vmatprep.subr.bf16.mxu0 %v1166_v0 }
  0x62   :  { %997 = vmatpush3.bf16.msra.mxu0 %v996_v19 }
  0x63   :  { %998 = vmatprep.subr.bf16.mxu0 %v1166_v0 }
  0x66   :  { %1000 = vmatpush3.bf16.msra.mxu0 %v999_v22 }
  0x67   :  { %1001 = vmatprep.subr.bf16.mxu0 %v1166_v0 }
  0x6a   :  { %1003 = vmatpush3.bf16.msra.mxu0 %v1002_v25  ;;  %v737_v25 = vshrl.u32 %v736_v24, 7 }
  0x6b   :  { %965 = vmatprep.subr.mxu0 %v1168_v1 }
  0x6d   :  { %901 = vmatmul.mubr.f32.vlgmr.msra.gmra.mrb[0].mxu0 %v1287_v26 }
  0x6e   :  { %903 = vmatprep.mubr.msk.f32.mxu0 %vm1167_vm0, %v1168_v1 }
  0x71   :  { %904 = vmatmul.mubr.f32.gmra.mrb[2].mxu0 %v1293_v27 }
  0x72   :  { %906 = vmatprep.mubr.msk.f32.mxu0 %vm1167_vm0, %v1168_v1 }
  0x75   :  { %907 = vmatmul.mubr.f32.gmra.mrb[4].mxu0 %v1298_v28 }
  0x76   :  { %967 = vmatprep.mubr.msk.f32.mxu0 %vm1167_vm0, %v1168_v1 }
 0x140   :  { %v180_v31 = vpop.f32.mrb[0].mxu0 }
 0x141   :  { %v181_v33 = vadd.f32 %v806_v30, %v180_v31  ;;  %v902_v34 = vpop.f32.mrb[1].mxu0  ;;  %v754_v31 = vsub.f32 1.0, %v730_v29 }
 0x143   :  { %910 = vmatpush3.msra.mxu1 %v181_v33 }
 0x144   :  { %912 = vmatmul.mubr.msk.f32.vlgmr.msra.gmra.mrb[0].mxu1 %vm194_vm1, %v816_v32  ;;  %v185_v36 = vpop.f32.mrb[2].mxu0  ;;  %914 = vmatprep.subr.mxu1 %v1168_v1 }
 0x145   :  { %v186_v37 = vadd.f32 %v806_v30, %v185_v36  ;;  %v905_v38 = vpop.f32.mrb[3].mxu0  ;;  %916 = vmatprep.mubr.msk.f32.mxu1 %vm1167_vm0, %v1168_v1 }
 0x147   :  { %915 = vmatpush3.msra.mxu1 %v186_v37 }
 0x148   :  { %v190_v42 = vpop.f32.mrb[4].mxu0  ;;  %917 = vmatmul.mubr.msk.f32.vlgmr.msra.gmra.mrb[2].mxu1 %vm194_vm1, %v817_v35  ;;  %919 = vmatprep.subr.mxu1 %v1168_v1 }
 0x149   :  { %v191_v44 = vadd.f32 %v806_v30, %v190_v42  ;;  %v908_v45 = vpop.f32.mrb[5].mxu0  ;;  %921 = vmatprep.mubr.msk.f32.mxu1 %vm1167_vm0, %v1168_v1  ;;  %v738_v30 = vsub.s32 0, %v737_v25 }
 0x14b   :  { %920 = vmatpush3.msra.mxu1 %v191_v44  ;;  %v763_v33 = vrot.slane %v754_v31, %v738_v30 }
 0x14c   :  { %922 = vmatmul.mubr.msk.f32.vlgmr.msra.gmra.mrb[4].mxu1 %vm194_vm1, %v90_v43  ;;  %1004 = vmatprep.subr.bf16.mxu1 %v1166_v0 }
 0x14d   :  { %1006 = vmatpush3.bf16.msra.mxu1 %v1005_v46  ;;  %956 = vmatprep.mubr.msk.f32.mxu1 %vm1167_vm0, %v1168_v1  ;;  %v775_v36 = vmul.f32 %v763_v33, %v1287_v26 }
 0x14e   :  { %1007 = vmatprep.subr.bf16.mxu1 %v1166_v0 }
 0x151   :  { %1009 = vmatpush3.bf16.msra.mxu1 %v1008_v49 }
 0x152   :  { %1010 = vmatprep.subr.bf16.mxu1 %v1166_v0 }
 0x155   :  { %1012 = vmatpush3.bf16.msra.mxu1 %v1011_v52 }
 0x156   :  { %1013 = vmatprep.subr.bf16.mxu1 %v1166_v0 }
 0x159   :  { %1015 = vmatpush3.bf16.msra.mxu1 %v1014_v55 }
 0x15a   :  { %1016 = vmatprep.subr.bf16.mxu1 %v1166_v0 }
 0x15d   :  { %1018 = vmatpush3.bf16.msra.mxu1 %v1017_v58 }
 0x15e   :  { %1019 = vmatprep.subr.bf16.mxu1 %v1166_v0 }
 0x161   :  { %1021 = vmatpush3.bf16.msra.mxu1 %v1020_v61 }
 0x162   :  { %1022 = vmatprep.subr.bf16.mxu1 %v1166_v0 }
 0x165   :  { %1024 = vmatpush3.bf16.msra.mxu1 %v1023_v2 }
 0x166   :  { %1025 = vmatprep.subr.bf16.mxu1 %v1166_v0 }
 0x169   :  { %1027 = vmatpush3.bf16.msra.mxu1 %v1026_v5 }
 0x217   :  { %v264_v6 = vpop.f32.mrb[0].mxu1 }
 0x218   :  { %v414_v7 = vmax.f32 %v264_v6, 0.0  ;;  %v913_v8 = vpop.f32.mrb[1].mxu1 }
 0x21a   :  { %957 = vmatmul.mubr.f32.vlgmr.msra.gmra.mrb[6].mxu1 %v414_v7 }
 0x21b   :  { %v337_v9 = vpop.f32.mrb[2].mxu1  ;;  %959 = vmatprep.mubr.msk.f32.mxu1 %vm1167_vm0, %v1168_v1 }
 0x21c   :  { %v415_v10 = vmax.f32 %v337_v9, 0.0  ;;  %v918_v11 = vpop.f32.mrb[3].mxu1 }
 0x21e   :  { %960 = vmatmul.mubr.f32.gmra.mrb[8].mxu1 %v415_v10 }
 0x21f   :  { %v410_v12 = vpop.f32.mrb[4].mxu1  ;;  %962 = vmatprep.mubr.msk.f32.mxu1 %vm1167_vm0, %v1168_v1 }
 0x220   :  { %v416_v0 = vmax.f32 %v410_v12, 0.0  ;;  %v923_v13 = vpop.f32.mrb[5].mxu1 }
 0x222   :  { %963 = vmatmul.mubr.f32.gmra.mrb[10].mxu1 %v416_v0 }
 0x2ed   :  { %v506_v15 = vpop.f32.mrb[6].mxu1 }
 0x2ee   :  { %v507_v16 = vadd.f32 %v810_v14, %v506_v15  ;;  %v958_v17 = vpop.f32.mrb[7].mxu1 }
 0x2f0   :  { %966 = vmatpush3.msra.mxu0 %v507_v16 }
 0x2f1   :  { %v511_v18 = vpop.f32.mrb[8].mxu1  ;;  %968 = vmatmul.mubr.msk.f32.vlgmr.msra.gmra.mrb[6].mxu0 %vm194_vm1, %v816_v32  ;;  %970 = vmatprep.subr.mxu0 %v1168_v1  ;;  %v731_v32 = vld [vmem:[%s1393_s6 + $0x1] sm:$0x1] }
 0x2f2   :  { %v512_v19 = vadd.f32 %v810_v14, %v511_v18  ;;  %v961_v20 = vpop.f32.mrb[9].mxu1  ;;  %972 = vmatprep.mubr.msk.f32.mxu0 %vm1167_vm0, %v1168_v1  ;;  %v755_v34 = vsub.f32 1.0, %v731_v32  ;;  %v743_v42 = vrot.slane %v731_v32, %v738_v30 }
 0x2f4   :  { %971 = vmatpush3.msra.mxu0 %v512_v19  ;;  %v767_v37 = vrot.slane %v755_v34, %v738_v30 }
 0x2f5   :  { %v516_v21 = vpop.f32.mrb[10].mxu1  ;;  %973 = vmatmul.mubr.msk.f32.vlgmr.msra.gmra.mrb[8].mxu0 %vm194_vm1, %v817_v35  ;;  %975 = vmatprep.subr.mxu0 %v1168_v1  ;;  %v739_v35 = vrot.slane %v730_v29, %v738_v30 }
 0x2f6   :  { %v517_v22 = vadd.f32 %v810_v14, %v516_v21  ;;  %v964_v23 = vpop.f32.mrb[11].mxu1  ;;  %977 = vmatprep.mubr.msk.f32.mxu0 %vm1167_vm0, %v1168_v1  ;;  %v732_v1 = vld [vmem:[%s1393_s6 + $0x2] sm:$0x1]  ;;  %s1169_s6 = smov [#allocation10]  }
 0x2f7   :  { %v756_v38 = vsub.f32 1.0, %v732_v1  ;;  %v747_v50 = vrot.slane %v732_v1, %v738_v30  ;;  %s792_s12 = sshll.u32 %s1169_s6, 4  ;;  %s793_s12 = int_to_ptr.vmem [resolvable:$true] %s792_s12 }
 0x2f8   :  { %976 = vmatpush3.msra.mxu0 %v517_v22  ;;  %s1128_s13 = scalar_lea.vmem %s793_s12, 384  ;;  %p1133_p5 = scmp.lt.s32.totalorder %s793_s12, %s793_s12 }
 0x2f9   :  { %978 = vmatmul.mubr.msk.f32.vlgmr.msra.gmra.mrb[10].mxu0 %vm194_vm1, %v90_v43  ;;  %v776_v43 = vmul.f32 %v767_v37, %v1293_v27  ;;  %v771_v44 = vrot.slane %v756_v38, %v738_v30  ;;  %p1129_p4 = scmp.ne.s32.totalorder %s793_s12, %s1128_s13  ;;  %p1134_p6 = scmp.lt.s32.totalorder %s1128_s13, %s1128_s13 }
 0x2fb   :  { %v777_v51 = vmul.f32 %v771_v44, %v1298_v28  ;;  %p1135_p7 = por %p1134_p6, %p1133_p5 }
 0x2fd   :  { %p1136_p8 = pnand %p1135_p7, %p1129_p4 }
 0x3c4   :  { %v586_v39 = vpop.f32.mrb[6].mxu0 }
 0x3c5   :  { %v751_v40 = vmul.f32 %v739_v35, %v586_v39  ;;  %v969_v41 = vpop.f32.mrb[7].mxu0 }
 0x3c7   :  { %v778_v45 = vadd.f32 %v775_v36, %v751_v40 }
 0x3c8   :  { %v656_v46 = vpop.f32.mrb[8].mxu0 }
 0x3c9   :  { %v781_v47 = vmax.f32 %v778_v45, 0.0  ;;  %v752_v48 = vmul.f32 %v743_v42, %v656_v46  ;;  %v974_v49 = vpop.f32.mrb[9].mxu0 }
 0x3cb   :  { %784 = vst [vmem:[#allocation10] sm:$0xff] %v781_v47  ;;  %v779_v52 = vadd.f32 %v776_v43, %v752_v48 }
 0x3cc   :  { %v726_v26 = vpop.f32.mrb[10].mxu0 }
 0x3cd   :  { %v782_v53 = vmax.f32 %v779_v52, 0.0  ;;  %v753_v54 = vmul.f32 %v747_v50, %v726_v26  ;;  %v979_v55 = vpop.f32.mrb[11].mxu0 }
 0x3cf   :  { %785 = vst [vmem:[#allocation10 + $0x8] sm:$0xff] %v782_v53  ;;  %v780_v56 = vadd.f32 %v777_v51, %v753_v54 }
 0x3d1   :  { %v783_v27 = vmax.f32 %v780_v56, 0.0 }
 0x3d3   :  { %786 = vst [vmem:[#allocation10 + $0x10] sm:$0xff] %v783_v27 }
 0x3d4   :  { %1139 = shalt.err (!%p1136_p8)
}
 0x3d5   :  { %s1140_s0 = scalar_lea.hbm %s1394_s7, 384 }
 0x3d6   :  { %p1141_p9 = scmp.ne.s32.totalorder %s1394_s7, %s1140_s0  ;;  %p1144_p10 = scmp.lt.u32.totalorder %s1140_s0, %s1394_s7 }
 0x3d8   :  { %p1146_p11 = pnand %p1144_p10, %p1141_p9 }
 0x3da   :  { %1149 = shalt.err (!%p1146_p11)
}
 0x3db   :  { %798 = dma.vmem_to_hbm [thread:$0]  %s793_s12, 384, %s1394_s7, [#allocation4], %s1162_s1, %s1162_s1, %s1163_s25  }
 0x3dc   :  { %1156 = dma.done.wait [#allocation4], 384  }
 0x3dd   :  { %1157 = vsyncadd [#allocation4], 4294966912 }
 0x3de   :  { %802 = vsyncpa [#allocation3], 1 }
 0x3df   :  { %803 = vsyncpa [#allocation6], 1 }
 0x3e0   :  { %804 = vsyncpa [#allocation9], 1 }
 0x3e1   :  { %805 = vsyncpa [#allocation4], 1 }

</bundles_post_ra>
